<compile_context>
chip_gen: v6e
topology: v6e:2x2x1
jax: 0.10.0
libtpu: 0.0.40
codegen_flags: <defaults>
</compile_context>

<pallas_src>
import jax
import jax.numpy as jnp
from jax.experimental import pallas as pl
from jax.experimental.pallas import tpu as pltpu

# ----- model dimensions (small, synthetic) ------------------------------
B, S, D = 2, 8, 32          # batch, sequence length, transformer width
H = 4                       # attention heads
DH = D // H                 # head dim
DFF = 4 * D                 # MLP hidden
DP = 16                     # text_projection output dim
DPP = 128                   # lane-dense padded projection width
L = 2                       # number of residual attention blocks
BS = B * S                  # flattened tokens
OB = 8                      # output rows padded to a full sublane tile
LN_EPS = 1e-5

# ----- packed "square" weight array row offsets (lane width D) ----------
R_WQ, R_WK, R_WV, R_WO = 0, D, 2 * D, 3 * D
R_WP = 4 * D                                    # MLP down-proj (DFF rows)
R_VEC = 4 * D + DFF                             # 9 single-row vectors follow
(R_LN1G, R_LN1B, R_BQ, R_BK, R_BV,
 R_BO, R_LN2G, R_LN2B, R_BP) = range(R_VEC, R_VEC + 9)
WSQ_ROWS = R_VEC + 9                            # 265

# ----- globals-pack row offsets (lane width DPP) -------------------------
G_POS = 0                   # BS rows (lanes 0:D)  pre-tiled positional emb
G_LNF = BS                  # 2 rows  (lanes 0:D)  ln_final gamma / beta
G_HM = BS + 2               # H rows  (lanes 0:D)  per-head lane masks
G_BIAS = 24                 # BS rows (lanes 0:BS) additive causal/batch bias
G_PROJ = G_BIAS + BS        # D rows  (lanes 0:DPP) padded text_projection
G_ROWS = G_PROJ + D         # 72


def _layernorm(x, g, b):
    mu = jnp.mean(x, axis=-1, keepdims=True)
    var = jnp.mean(jnp.square(x - mu), axis=-1, keepdims=True)
    return (x - mu) * jax.lax.rsqrt(var + LN_EPS) * g + b


# ------------------------------------------------------------------------
# Fused kernel: one grid step == one residual attention block.
# ------------------------------------------------------------------------
def _text_encoder_kernel(x_ref, oh_ref, wsq_ref, wfc_ref, glob_ref,
                         o_ref, xs_ref):
    l_first = pl.program_id(0) == 0
    l_last = pl.program_id(0) == pl.num_programs(0) - 1

    # ---- step 0: residual stream <- prompts + positional embedding ----
    @pl.when(l_first)
    def _():
        xs_ref[...] = x_ref[...] + glob_ref[G_POS:G_POS + BS, 0:D]

    x = xs_ref[...]                                            # (BS, D)

    # Per-layer parameters: layer axis already selected by the BlockSpec,
    # everything else is a static, tile-aligned sublane slice (free).
    # TODO(synk): for v6e/v7x at real CLIP widths, cast matmul operands to
    # bf16 here (keep f32 accumulation); skipped at D=32 to preserve parity.
    w_q = wsq_ref[0, R_WQ:R_WQ + D, :]          # 1/sqrt(DH) pre-folded
    w_k = wsq_ref[0, R_WK:R_WK + D, :]
    w_v = wsq_ref[0, R_WV:R_WV + D, :]
    w_o = wsq_ref[0, R_WO:R_WO + D, :]
    w_p = wsq_ref[0, R_WP:R_WP + DFF, :]
    ln1_g = wsq_ref[0, R_LN1G:R_LN1G + 1, :]
    ln1_b = wsq_ref[0, R_LN1B:R_LN1B + 1, :]
    b_q = wsq_ref[0, R_BQ:R_BQ + 1, :]
    b_k = wsq_ref[0, R_BK:R_BK + 1, :]
    b_v = wsq_ref[0, R_BV:R_BV + 1, :]
    b_o = wsq_ref[0, R_BO:R_BO + 1, :]
    ln2_g = wsq_ref[0, R_LN2G:R_LN2G + 1, :]
    ln2_b = wsq_ref[0, R_LN2B:R_LN2B + 1, :]
    b_p = wsq_ref[0, R_BP:R_BP + 1, :]
    w_fc = wfc_ref[0, 0:D, :]
    b_fc = wfc_ref[0, D:D + 1, :]

    bias = glob_ref[G_BIAS:G_BIAS + BS, 0:BS]   # precomputed additive mask

    # ---- attention: full-width q/k/v, per-head lane masks (no slices) ----
    xn = _layernorm(x, ln1_g, ln1_b)
    q = jnp.dot(xn, w_q, preferred_element_type=jnp.float32) + b_q
    k = jnp.dot(xn, w_k, preferred_element_type=jnp.float32) + b_k
    v = jnp.dot(xn, w_v, preferred_element_type=jnp.float32) + b_v
    kt = k.T                                    # one XLU transpose per layer

    attn = None
    for h in range(H):                          # static; heads -> disjoint lanes
        hm = glob_ref[G_HM + h:G_HM + h + 1, 0:D]        # (1, D) lane mask
        s = jnp.dot(q * hm, kt, preferred_element_type=jnp.float32) + bias
        s = s - jnp.max(s, axis=-1, keepdims=True)
        p = jnp.exp(s)
        p = p * pl.reciprocal(jnp.sum(p, axis=-1, keepdims=True), approx=False)
        o_h = jnp.dot(p, v * hm, preferred_element_type=jnp.float32)
        attn = o_h if attn is None else attn + o_h

    x = x + jnp.dot(attn, w_o, preferred_element_type=jnp.float32) + b_o

    # ---- MLP with QuickGELU: x * sigmoid(1.702 * x) ----
    xn2 = _layernorm(x, ln2_g, ln2_b)
    hdn = jnp.dot(xn2, w_fc, preferred_element_type=jnp.float32) + b_fc
    hdn = hdn * jax.nn.sigmoid(1.702 * hdn)
    x = x + jnp.dot(hdn, w_p, preferred_element_type=jnp.float32) + b_p
    xs_ref[...] = x

    # ---- last step: EOT gather (one-hot matmul) + ln_final + projection ----
    @pl.when(l_last)
    def _():
        g = jnp.dot(oh_ref[...], x, preferred_element_type=jnp.float32)
        g = _layernorm(g, glob_ref[G_LNF:G_LNF + 1, 0:D],
                       glob_ref[G_LNF + 1:G_LNF + 2, 0:D])
        o_ref[...] = jnp.dot(g, glob_ref[G_PROJ:G_PROJ + D, :],
                             preferred_element_type=jnp.float32)


def text_encoder_fused(x2d, onehot, wsq, wfc, glob):
    return pl.pallas_call(
        _text_encoder_kernel,
        out_shape=jax.ShapeDtypeStruct((OB, DPP), jnp.float32),
        grid=(L,),
        in_specs=[
            pl.BlockSpec((BS, D), lambda l: (0, 0)),            # prompts
            pl.BlockSpec((OB, BS), lambda l: (0, 0)),           # EOT one-hot
            pl.BlockSpec((1, WSQ_ROWS, D), lambda l: (l, 0, 0)),  # per-layer
            pl.BlockSpec((1, D + 1, DFF), lambda l: (l, 0, 0)),   # per-layer
            pl.BlockSpec((G_ROWS, DPP), lambda l: (0, 0)),       # globals
        ],
        out_specs=pl.BlockSpec((OB, DPP), lambda l: (0, 0)),
        scratch_shapes=[pltpu.VMEM((BS, D), jnp.float32)],       # residual
        compiler_params=pltpu.CompilerParams(
            dimension_semantics=("arbitrary",)),   # layers are sequential
    )(x2d, onehot, wsq, wfc, glob)


# ------------------------------------------------------------------------
# Full TextEncoder.forward (packing is done once at init, not per call)
# ------------------------------------------------------------------------
@jax.jit
def text_encoder(prompts, tokenized_prompts, packed):
    eot = jnp.argmax(tokenized_prompts, axis=-1)                 # (B,)
    onehot = jax.nn.one_hot(jnp.arange(B) * S + eot, BS, dtype=jnp.float32)
    onehot = jnp.pad(onehot, ((0, OB - B), (0, 0)))              # (OB, BS)
    out = text_encoder_fused(prompts.reshape(BS, D), onehot,
                             packed['wsq'], packed['wfc'], packed['glob'])
    return out[:B, :DP]


def pack_params(params):
    """One-time weight packing (outside the jitted hot path)."""
    scale = 1.0 / (DH ** 0.5)
    wsq_l, wfc_l = [], []
    for lp in params['layers']:
        w_q = lp['w_qkv'][:, 0:D] * scale        # fold attention scale into q
        w_k = lp['w_qkv'][:, D:2 * D]
        w_v = lp['w_qkv'][:, 2 * D:3 * D]
        b_q = lp['b_qkv'][:, 0:D] * scale
        b_k = lp['b_qkv'][:, D:2 * D]
        b_v = lp['b_qkv'][:, 2 * D:3 * D]
        wsq_l.append(jnp.concatenate(
            [w_q, w_k, w_v, lp['w_out'], lp['w_proj'],
             lp['ln1_g'], lp['ln1_b'], b_q, b_k, b_v, lp['b_out'],
             lp['ln2_g'], lp['ln2_b'], lp['b_proj']], axis=0))
        wfc_l.append(jnp.concatenate([lp['w_fc'], lp['b_fc']], axis=0))
    wsq = jnp.stack(wsq_l)                       # (L, WSQ_ROWS, D)
    wfc = jnp.stack(wfc_l)                       # (L, D+1, DFF)

    pos_tiled = jnp.tile(params['pos'], (B, 1))                   # (BS, D)
    hm = (jnp.arange(D)[None, :] // DH
          == jnp.arange(H)[:, None]).astype(jnp.float32)          # (H, D)
    r = jnp.arange(BS)
    keep = ((r[:, None] // S) == (r[None, :] // S)) & \
           ((r[None, :] % S) <= (r[:, None] % S))
    bias = jnp.where(keep, 0.0, -1e30).astype(jnp.float32)        # (BS, BS)
    proj = jnp.pad(params['text_proj'], ((0, 0), (0, DPP - DP)))  # (D, DPP)

    glob = jnp.zeros((G_ROWS, DPP), jnp.float32)
    glob = glob.at[G_POS:G_POS + BS, 0:D].set(pos_tiled)
    glob = glob.at[G_LNF, 0:D].set(params['lnf_g'][0])
    glob = glob.at[G_LNF + 1, 0:D].set(params['lnf_b'][0])
    glob = glob.at[G_HM:G_HM + H, 0:D].set(hm)
    glob = glob.at[G_BIAS:G_BIAS + BS, 0:BS].set(bias)
    glob = glob.at[G_PROJ:G_PROJ + D, :].set(proj)
    return {'wsq': wsq, 'wfc': wfc, 'glob': glob}


# ------------------------------------------------------------------------
# Deterministic synthetic parameters + pure-JAX reference for validation.
# ------------------------------------------------------------------------
def init_params(key):
    kit = iter(jax.random.split(key, 8 + 8 * L))

    def nrm(shape, scale=0.02):
        return (scale * jax.random.normal(next(kit), shape)).astype(jnp.float32)

    params = {
        'pos': nrm((S, D)),
        'lnf_g': jnp.ones((1, D), jnp.float32),
        'lnf_b': jnp.zeros((1, D), jnp.float32),
        'text_proj': nrm((D, DP)),
        'layers': [],
    }
    for _ in range(L):
        params['layers'].append({
            'ln1_g': jnp.ones((1, D), jnp.float32),
            'ln1_b': jnp.zeros((1, D), jnp.float32),
            'w_qkv': nrm((D, 3 * D)),
            'b_qkv': nrm((1, 3 * D)),
            'w_out': nrm((D, D)),
            'b_out': nrm((1, D)),
            'ln2_g': jnp.ones((1, D), jnp.float32),
            'ln2_b': jnp.zeros((1, D), jnp.float32),
            'w_fc': nrm((D, DFF)),
            'b_fc': nrm((1, DFF)),
            'w_proj': nrm((DFF, D)),
            'b_proj': nrm((1, D)),
        })
    return params


def reference(prompts, tokens, params):
    x = prompts + params['pos']
    mask = jnp.tril(jnp.ones((S, S), dtype=bool))
    for lp in params['layers']:
        xn = _layernorm(x, lp['ln1_g'], lp['ln1_b'])
        qkv = xn @ lp['w_qkv'] + lp['b_qkv']
        q, k, v = jnp.split(qkv, 3, axis=-1)

        def split_heads(t):
            return t.reshape(B, S, H, DH).transpose(0, 2, 1, 3)

        qh, kh, vh = split_heads(q), split_heads(k), split_heads(v)
        s = jnp.einsum('bhqd,bhkd->bhqk', qh, kh) / (DH ** 0.5)
        s = jnp.where(mask, s, -1e30)
        p = jax.nn.softmax(s, axis=-1)
        o = jnp.einsum('bhqk,bhkd->bhqd', p, vh).transpose(0, 2, 1, 3)
        o = o.reshape(B, S, D)
        x = x + o @ lp['w_out'] + lp['b_out']
        xn2 = _layernorm(x, lp['ln2_g'], lp['ln2_b'])
        hid = xn2 @ lp['w_fc'] + lp['b_fc']
        hid = hid * jax.nn.sigmoid(1.702 * hid)
        x = x + hid @ lp['w_proj'] + lp['b_proj']
    x = _layernorm(x, params['lnf_g'], params['lnf_b'])
    eot = jnp.argmax(tokens, axis=-1)
    return x[jnp.arange(B), eot] @ params['text_proj']


if __name__ == "__main__":
    key = jax.random.PRNGKey(0)
    kp, kx = jax.random.split(key)
    params = init_params(kp)
    packed = pack_params(params)        # one-time packing, off the hot path

    prompts = jax.random.normal(kx, (B, S, D), jnp.float32)
    tokenized_prompts = jnp.array(
        [[5, 2, 9, 1, 0, 0, 0, 0],
         [3, 4, 1, 8, 12, 2, 0, 0]], jnp.int32)   # argmax -> EOT positions

    out = text_encoder(prompts, tokenized_prompts, packed)
    out = jax.block_until_ready(out)

    ref = reference(prompts, tokenized_prompts, params)
    assert out.shape == (B, DP)
    assert jnp.allclose(out, ref, atol=2e-3, rtol=2e-3)
    print("KERNEL_OK")
</pallas_src>

<mosaic_0001>
module attributes {stable_mosaic.version = 11 : i64} {
  func.func @_text_encoder_kernel(%arg0: i32, %arg1: memref<16x32xf32, #tpu.memory_space<vmem>>, %arg2: memref<8x16xf32, #tpu.memory_space<vmem>>, %arg3: memref<1x265x32xf32, #tpu.memory_space<vmem>>, %arg4: memref<1x33x128xf32, #tpu.memory_space<vmem>>, %arg5: memref<72x128xf32, #tpu.memory_space<vmem>>, %arg6: memref<8x128xf32, #tpu.memory_space<vmem>>, %arg7: memref<16x32xf32, #tpu.memory_space<vmem>>) attributes {dimension_semantics = [#tpu.dimension_semantics<arbitrary>], iteration_bounds = array<i64: 2>, scalar_prefetch = 0 : i64, scratch_operands = 1 : i64, tpu.core_type = #tpu.core_type<tc>, window_params = [{pipeline_mode = #tpu.pipeline_mode<synchronous>, transform_indices = @transform_0, window_bounds = array<i64: 16, 32>}, {pipeline_mode = #tpu.pipeline_mode<synchronous>, transform_indices = @transform_1, window_bounds = array<i64: 8, 16>}, {transform_indices = @transform_2, window_bounds = array<i64: 1, 265, 32>}, {transform_indices = @transform_3, window_bounds = array<i64: 1, 33, 128>}, {pipeline_mode = #tpu.pipeline_mode<synchronous>, transform_indices = @transform_4, window_bounds = array<i64: 72, 128>}, {pipeline_mode = #tpu.pipeline_mode<synchronous>, transform_indices = @transform_5, window_bounds = array<i64: 8, 128>}]} {
    %c0_i32 = arith.constant 0 : i32
    %0 = arith.cmpi eq, %arg0, %c0_i32 : i32
    %c1_i32 = arith.constant 1 : i32
    %1 = arith.cmpi eq, %arg0, %c1_i32 : i32
    %2 = arith.extui %0 : i1 to i32
    %c0_i32_0 = arith.constant 0 : i32
    %3 = arith.cmpi ne, %2, %c0_i32_0 : i32
    scf.if %3 {
      %c0_78 = arith.constant 0 : index
      %c0_79 = arith.constant 0 : index
      %189 = vector.load %arg1[%c0_78, %c0_79] : memref<16x32xf32, #tpu.memory_space<vmem>>, vector<16x32xf32>
      %c0_80 = arith.constant 0 : index
      %c0_81 = arith.constant 0 : index
      %190 = vector.load %arg5[%c0_80, %c0_81] : memref<72x128xf32, #tpu.memory_space<vmem>>, vector<16x32xf32>
      %191 = arith.addf %189, %190 : vector<16x32xf32>
      %c0_82 = arith.constant 0 : index
      %c0_83 = arith.constant 0 : index
      %192 = vector.load %arg7[%c0_82, %c0_83] : memref<16x32xf32, #tpu.memory_space<vmem>>, vector<16x32xf32>
      tpu.vector_store %arg7[%c0_82, %c0_83], %191 {strides = array<i32>} : memref<16x32xf32, #tpu.memory_space<vmem>>, vector<16x32xf32>,
    } else {
    }
    %c0 = arith.constant 0 : index
    %c0_1 = arith.constant 0 : index
    %4 = vector.load %arg7[%c0, %c0_1] : memref<16x32xf32, #tpu.memory_space<vmem>>, vector<16x32xf32>
    %c0_2 = arith.constant 0 : index
    %c0_3 = arith.constant 0 : index
    %c0_4 = arith.constant 0 : index
    %5 = vector.load %arg3[%c0_2, %c0_3, %c0_4] : memref<1x265x32xf32, #tpu.memory_space<vmem>>, vector<1x32x32xf32>
    %6 = vector.shape_cast %5 : vector<1x32x32xf32> to vector<32x32xf32>
    %c0_5 = arith.constant 0 : index
    %c32 = arith.constant 32 : index
    %c0_6 = arith.constant 0 : index
    %7 = vector.load %arg3[%c0_5, %c32, %c0_6] : memref<1x265x32xf32, #tpu.memory_space<vmem>>, vector<1x32x32xf32>
    %8 = vector.shape_cast %7 : vector<1x32x32xf32> to vector<32x32xf32>
    %c0_7 = arith.constant 0 : index
    %c64 = arith.constant 64 : index
    %c0_8 = arith.constant 0 : index
    %9 = vector.load %arg3[%c0_7, %c64, %c0_8] : memref<1x265x32xf32, #tpu.memory_space<vmem>>, vector<1x32x32xf32>
    %10 = vector.shape_cast %9 : vector<1x32x32xf32> to vector<32x32xf32>
    %c0_9 = arith.constant 0 : index
    %c96 = arith.constant 96 : index
    %c0_10 = arith.constant 0 : index
    %11 = vector.load %arg3[%c0_9, %c96, %c0_10] : memref<1x265x32xf32, #tpu.memory_space<vmem>>, vector<1x32x32xf32>
    %12 = vector.shape_cast %11 : vector<1x32x32xf32> to vector<32x32xf32>
    %c0_11 = arith.constant 0 : index
    %c128 = arith.constant 128 : index
    %c0_12 = arith.constant 0 : index
    %13 = vector.load %arg3[%c0_11, %c128, %c0_12] : memref<1x265x32xf32, #tpu.memory_space<vmem>>, vector<1x128x32xf32>
    %14 = vector.shape_cast %13 : vector<1x128x32xf32> to vector<128x32xf32>
    %c0_13 = arith.constant 0 : index
    %c256 = arith.constant 256 : index
    %c0_14 = arith.constant 0 : index
    %15 = vector.load %arg3[%c0_13, %c256, %c0_14] : memref<1x265x32xf32, #tpu.memory_space<vmem>>, vector<1x1x32xf32>
    %16 = vector.shape_cast %15 : vector<1x1x32xf32> to vector<1x32xf32>
    %c0_15 = arith.constant 0 : index
    %c257 = arith.constant 257 : index
    %c0_16 = arith.constant 0 : index
    %17 = vector.load %arg3[%c0_15, %c257, %c0_16] : memref<1x265x32xf32, #tpu.memory_space<vmem>>, vector<1x1x32xf32>
    %18 = vector.shape_cast %17 : vector<1x1x32xf32> to vector<1x32xf32>
    %c0_17 = arith.constant 0 : index
    %c258 = arith.constant 258 : index
    %c0_18 = arith.constant 0 : index
    %19 = vector.load %arg3[%c0_17, %c258, %c0_18] : memref<1x265x32xf32, #tpu.memory_space<vmem>>, vector<1x1x32xf32>
    %20 = vector.shape_cast %19 : vector<1x1x32xf32> to vector<1x32xf32>
    %c0_19 = arith.constant 0 : index
    %c259 = arith.constant 259 : index
    %c0_20 = arith.constant 0 : index
    %21 = vector.load %arg3[%c0_19, %c259, %c0_20] : memref<1x265x32xf32, #tpu.memory_space<vmem>>, vector<1x1x32xf32>
    %22 = vector.shape_cast %21 : vector<1x1x32xf32> to vector<1x32xf32>
    %c0_21 = arith.constant 0 : index
    %c260 = arith.constant 260 : index
    %c0_22 = arith.constant 0 : index
    %23 = vector.load %arg3[%c0_21, %c260, %c0_22] : memref<1x265x32xf32, #tpu.memory_space<vmem>>, vector<1x1x32xf32>
    %24 = vector.shape_cast %23 : vector<1x1x32xf32> to vector<1x32xf32>
    %c0_23 = arith.constant 0 : index
    %c261 = arith.constant 261 : index
    %c0_24 = arith.constant 0 : index
    %25 = vector.load %arg3[%c0_23, %c261, %c0_24] : memref<1x265x32xf32, #tpu.memory_space<vmem>>, vector<1x1x32xf32>
    %26 = vector.shape_cast %25 : vector<1x1x32xf32> to vector<1x32xf32>
    %c0_25 = arith.constant 0 : index
    %c262 = arith.constant 262 : index
    %c0_26 = arith.constant 0 : index
    %27 = vector.load %arg3[%c0_25, %c262, %c0_26] : memref<1x265x32xf32, #tpu.memory_space<vmem>>, vector<1x1x32xf32>
    %28 = vector.shape_cast %27 : vector<1x1x32xf32> to vector<1x32xf32>
    %c0_27 = arith.constant 0 : index
    %c263 = arith.constant 263 : index
    %c0_28 = arith.constant 0 : index
    %29 = vector.load %arg3[%c0_27, %c263, %c0_28] : memref<1x265x32xf32, #tpu.memory_space<vmem>>, vector<1x1x32xf32>
    %30 = vector.shape_cast %29 : vector<1x1x32xf32> to vector<1x32xf32>
    %c0_29 = arith.constant 0 : index
    %c264 = arith.constant 264 : index
    %c0_30 = arith.constant 0 : index
    %31 = vector.load %arg3[%c0_29, %c264, %c0_30] : memref<1x265x32xf32, #tpu.memory_space<vmem>>, vector<1x1x32xf32>
    %32 = vector.shape_cast %31 : vector<1x1x32xf32> to vector<1x32xf32>
    %c0_31 = arith.constant 0 : index
    %c0_32 = arith.constant 0 : index
    %c0_33 = arith.constant 0 : index
    %33 = vector.load %arg4[%c0_31, %c0_32, %c0_33] : memref<1x33x128xf32, #tpu.memory_space<vmem>>, vector<1x32x128xf32>
    %34 = vector.shape_cast %33 : vector<1x32x128xf32> to vector<32x128xf32>
    %c0_34 = arith.constant 0 : index
    %c32_35 = arith.constant 32 : index
    %c0_36 = arith.constant 0 : index
    %35 = vector.load %arg4[%c0_34, %c32_35, %c0_36] : memref<1x33x128xf32, #tpu.memory_space<vmem>>, vector<1x1x128xf32>
    %36 = vector.shape_cast %35 : vector<1x1x128xf32> to vector<1x128xf32>
    %c24 = arith.constant 24 : index
    %c0_37 = arith.constant 0 : index
    %37 = vector.load %arg5[%c24, %c0_37] : memref<72x128xf32, #tpu.memory_space<vmem>>, vector<16x16xf32>
    %cst = arith.constant dense<0.000000e+00> : vector<16xf32>
    %38 = vector.multi_reduction <add>, %4, %cst [1] : vector<16x32xf32> to vector<16xf32>
    %39 = vector.shape_cast %38 : vector<16xf32> to vector<16x1xf32>
    %cst_38 = arith.constant 3.200000e+01 : f32
    %40 = vector.broadcast %cst_38 : f32 to vector<16x1xf32>
    %41 = arith.divf %39, %40 : vector<16x1xf32>
    %42 = vector.broadcast %41 : vector<16x1xf32> to vector<16x32xf32>
    %43 = arith.subf %4, %42 : vector<16x32xf32>
    %44 = arith.mulf %43, %43 : vector<16x32xf32>
    %cst_39 = arith.constant dense<0.000000e+00> : vector<16xf32>
    %45 = vector.multi_reduction <add>, %44, %cst_39 [1] : vector<16x32xf32> to vector<16xf32>
    %46 = vector.shape_cast %45 : vector<16xf32> to vector<16x1xf32>
    %cst_40 = arith.constant 3.200000e+01 : f32
    %47 = vector.broadcast %cst_40 : f32 to vector<16x1xf32>
    %48 = arith.divf %46, %47 : vector<16x1xf32>
    %49 = vector.broadcast %41 : vector<16x1xf32> to vector<16x32xf32>
    %50 = arith.subf %4, %49 : vector<16x32xf32>
    %cst_41 = arith.constant 9.99999974E-6 : f32
    %51 = vector.broadcast %cst_41 : f32 to vector<16x1xf32>
    %52 = arith.addf %48, %51 : vector<16x1xf32>
    %53 = math.rsqrt %52 : vector<16x1xf32>
    %54 = vector.broadcast %53 : vector<16x1xf32> to vector<16x32xf32>
    %55 = arith.mulf %50, %54 : vector<16x32xf32>
    %56 = vector.broadcast %16 : vector<1x32xf32> to vector<16x32xf32>
    %57 = arith.mulf %55, %56 : vector<16x32xf32>
    %58 = vector.broadcast %18 : vector<1x32xf32> to vector<16x32xf32>
    %59 = arith.addf %57, %58 : vector<16x32xf32>
    %cst_42 = arith.constant dense<0.000000e+00> : vector<16x32xf32>
    %60 = tpu.matmul %59, %6, %cst_42 {dimension_numbers = #tpu.dot_dimension_numbers<[1], [0], [0], [1], [0, 0, 1, 1], [], []>} : vector<16x32xf32>, vector<32x32xf32>, vector<16x32xf32> -> vector<16x32xf32>
    %61 = vector.broadcast %20 : vector<1x32xf32> to vector<16x32xf32>
    %62 = arith.addf %60, %61 : vector<16x32xf32>
    %cst_43 = arith.constant dense<0.000000e+00> : vector<16x32xf32>
    %63 = tpu.matmul %59, %8, %cst_43 {dimension_numbers = #tpu.dot_dimension_numbers<[1], [0], [0], [1], [0, 0, 1, 1], [], []>} : vector<16x32xf32>, vector<32x32xf32>, vector<16x32xf32> -> vector<16x32xf32>
    %64 = vector.broadcast %22 : vector<1x32xf32> to vector<16x32xf32>
    %65 = arith.addf %63, %64 : vector<16x32xf32>
    %cst_44 = arith.constant dense<0.000000e+00> : vector<16x32xf32>
    %66 = tpu.matmul %59, %10, %cst_44 {dimension_numbers = #tpu.dot_dimension_numbers<[1], [0], [0], [1], [0, 0, 1, 1], [], []>} : vector<16x32xf32>, vector<32x32xf32>, vector<16x32xf32> -> vector<16x32xf32>
    %67 = vector.broadcast %24 : vector<1x32xf32> to vector<16x32xf32>
    %68 = arith.addf %66, %67 : vector<16x32xf32>
    %69 = tpu.transpose %65, [1, 0] : vector<16x32xf32> -> vector<32x16xf32>
    %c18 = arith.constant 18 : index
    %c0_45 = arith.constant 0 : index
    %70 = vector.load %arg5[%c18, %c0_45] : memref<72x128xf32, #tpu.memory_space<vmem>>, vector<1x32xf32>
    %71 = vector.broadcast %70 : vector<1x32xf32> to vector<16x32xf32>
    %72 = arith.mulf %62, %71 : vector<16x32xf32>
    %cst_46 = arith.constant dense<0.000000e+00> : vector<16x16xf32>
    %73 = tpu.matmul %72, %69, %cst_46 {dimension_numbers = #tpu.dot_dimension_numbers<[1], [0], [0], [1], [0, 0, 1, 1], [], []>} : vector<16x32xf32>, vector<32x16xf32>, vector<16x16xf32> -> vector<16x16xf32>
    %74 = arith.addf %73, %37 : vector<16x16xf32>
    %cst_47 = arith.constant dense<0xFF800000> : vector<16xf32>
    %75 = vector.multi_reduction <maximumf>, %74, %cst_47 [1] : vector<16x16xf32> to vector<16xf32>
    %76 = vector.shape_cast %75 : vector<16xf32> to vector<16x1xf32>
    %77 = vector.broadcast %76 : vector<16x1xf32> to vector<16x16xf32>
    %78 = arith.subf %74, %77 : vector<16x16xf32>
    %79 = math.exp %78 : vector<16x16xf32>
    %cst_48 = arith.constant dense<0.000000e+00> : vector<16xf32>
    %80 = vector.multi_reduction <add>, %79, %cst_48 [1] : vector<16x16xf32> to vector<16xf32>
    %81 = vector.shape_cast %80 : vector<16xf32> to vector<16x1xf32>
    %82 = tpu.reciprocal %81 : vector<16x1xf32> -> vector<16x1xf32>
    %83 = vector.broadcast %82 : vector<16x1xf32> to vector<16x16xf32>
    %84 = arith.mulf %79, %83 : vector<16x16xf32>
    %85 = vector.broadcast %70 : vector<1x32xf32> to vector<16x32xf32>
    %86 = arith.mulf %68, %85 : vector<16x32xf32>
    %cst_49 = arith.constant dense<0.000000e+00> : vector<16x32xf32>
    %87 = tpu.matmul %84, %86, %cst_49 {dimension_numbers = #tpu.dot_dimension_numbers<[1], [0], [0], [1], [0, 0, 1, 1], [], []>} : vector<16x16xf32>, vector<16x32xf32>, vector<16x32xf32> -> vector<16x32xf32>
    %c19 = arith.constant 19 : index
    %c0_50 = arith.constant 0 : index
    %88 = vector.load %arg5[%c19, %c0_50] : memref<72x128xf32, #tpu.memory_space<vmem>>, vector<1x32xf32>
    %89 = vector.broadcast %88 : vector<1x32xf32> to vector<16x32xf32>
    %90 = arith.mulf %62, %89 : vector<16x32xf32>
    %cst_51 = arith.constant dense<0.000000e+00> : vector<16x16xf32>
    %91 = tpu.matmul %90, %69, %cst_51 {dimension_numbers = #tpu.dot_dimension_numbers<[1], [0], [0], [1], [0, 0, 1, 1], [], []>} : vector<16x32xf32>, vector<32x16xf32>, vector<16x16xf32> -> vector<16x16xf32>
    %92 = arith.addf %91, %37 : vector<16x16xf32>
    %cst_52 = arith.constant dense<0xFF800000> : vector<16xf32>
    %93 = vector.multi_reduction <maximumf>, %92, %cst_52 [1] : vector<16x16xf32> to vector<16xf32>
    %94 = vector.shape_cast %93 : vector<16xf32> to vector<16x1xf32>
    %95 = vector.broadcast %94 : vector<16x1xf32> to vector<16x16xf32>
    %96 = arith.subf %92, %95 : vector<16x16xf32>
    %97 = math.exp %96 : vector<16x16xf32>
    %cst_53 = arith.constant dense<0.000000e+00> : vector<16xf32>
    %98 = vector.multi_reduction <add>, %97, %cst_53 [1] : vector<16x16xf32> to vector<16xf32>
    %99 = vector.shape_cast %98 : vector<16xf32> to vector<16x1xf32>
    %100 = tpu.reciprocal %99 : vector<16x1xf32> -> vector<16x1xf32>
    %101 = vector.broadcast %100 : vector<16x1xf32> to vector<16x16xf32>
    %102 = arith.mulf %97, %101 : vector<16x16xf32>
    %103 = vector.broadcast %88 : vector<1x32xf32> to vector<16x32xf32>
    %104 = arith.mulf %68, %103 : vector<16x32xf32>
    %cst_54 = arith.constant dense<0.000000e+00> : vector<16x32xf32>
    %105 = tpu.matmul %102, %104, %cst_54 {dimension_numbers = #tpu.dot_dimension_numbers<[1], [0], [0], [1], [0, 0, 1, 1], [], []>} : vector<16x16xf32>, vector<16x32xf32>, vector<16x32xf32> -> vector<16x32xf32>
    %106 = arith.addf %87, %105 : vector<16x32xf32>
    %c20 = arith.constant 20 : index
    %c0_55 = arith.constant 0 : index
    %107 = vector.load %arg5[%c20, %c0_55] : memref<72x128xf32, #tpu.memory_space<vmem>>, vector<1x32xf32>
    %108 = vector.broadcast %107 : vector<1x32xf32> to vector<16x32xf32>
    %109 = arith.mulf %62, %108 : vector<16x32xf32>
    %cst_56 = arith.constant dense<0.000000e+00> : vector<16x16xf32>
    %110 = tpu.matmul %109, %69, %cst_56 {dimension_numbers = #tpu.dot_dimension_numbers<[1], [0], [0], [1], [0, 0, 1, 1], [], []>} : vector<16x32xf32>, vector<32x16xf32>, vector<16x16xf32> -> vector<16x16xf32>
    %111 = arith.addf %110, %37 : vector<16x16xf32>
    %cst_57 = arith.constant dense<0xFF800000> : vector<16xf32>
    %112 = vector.multi_reduction <maximumf>, %111, %cst_57 [1] : vector<16x16xf32> to vector<16xf32>
    %113 = vector.shape_cast %112 : vector<16xf32> to vector<16x1xf32>
    %114 = vector.broadcast %113 : vector<16x1xf32> to vector<16x16xf32>
    %115 = arith.subf %111, %114 : vector<16x16xf32>
    %116 = math.exp %115 : vector<16x16xf32>
    %cst_58 = arith.constant dense<0.000000e+00> : vector<16xf32>
    %117 = vector.multi_reduction <add>, %116, %cst_58 [1] : vector<16x16xf32> to vector<16xf32>
    %118 = vector.shape_cast %117 : vector<16xf32> to vector<16x1xf32>
    %119 = tpu.reciprocal %118 : vector<16x1xf32> -> vector<16x1xf32>
    %120 = vector.broadcast %119 : vector<16x1xf32> to vector<16x16xf32>
    %121 = arith.mulf %116, %120 : vector<16x16xf32>
    %122 = vector.broadcast %107 : vector<1x32xf32> to vector<16x32xf32>
    %123 = arith.mulf %68, %122 : vector<16x32xf32>
    %cst_59 = arith.constant dense<0.000000e+00> : vector<16x32xf32>
    %124 = tpu.matmul %121, %123, %cst_59 {dimension_numbers = #tpu.dot_dimension_numbers<[1], [0], [0], [1], [0, 0, 1, 1], [], []>} : vector<16x16xf32>, vector<16x32xf32>, vector<16x32xf32> -> vector<16x32xf32>
    %125 = arith.addf %106, %124 : vector<16x32xf32>
    %c21 = arith.constant 21 : index
    %c0_60 = arith.constant 0 : index
    %126 = vector.load %arg5[%c21, %c0_60] : memref<72x128xf32, #tpu.memory_space<vmem>>, vector<1x32xf32>
    %127 = vector.broadcast %126 : vector<1x32xf32> to vector<16x32xf32>
    %128 = arith.mulf %62, %127 : vector<16x32xf32>
    %cst_61 = arith.constant dense<0.000000e+00> : vector<16x16xf32>
    %129 = tpu.matmul %128, %69, %cst_61 {dimension_numbers = #tpu.dot_dimension_numbers<[1], [0], [0], [1], [0, 0, 1, 1], [], []>} : vector<16x32xf32>, vector<32x16xf32>, vector<16x16xf32> -> vector<16x16xf32>
    %130 = arith.addf %129, %37 : vector<16x16xf32>
    %cst_62 = arith.constant dense<0xFF800000> : vector<16xf32>
    %131 = vector.multi_reduction <maximumf>, %130, %cst_62 [1] : vector<16x16xf32> to vector<16xf32>
    %132 = vector.shape_cast %131 : vector<16xf32> to vector<16x1xf32>
    %133 = vector.broadcast %132 : vector<16x1xf32> to vector<16x16xf32>
    %134 = arith.subf %130, %133 : vector<16x16xf32>
    %135 = math.exp %134 : vector<16x16xf32>
    %cst_63 = arith.constant dense<0.000000e+00> : vector<16xf32>
    %136 = vector.multi_reduction <add>, %135, %cst_63 [1] : vector<16x16xf32> to vector<16xf32>
    %137 = vector.shape_cast %136 : vector<16xf32> to vector<16x1xf32>
    %138 = tpu.reciprocal %137 : vector<16x1xf32> -> vector<16x1xf32>
    %139 = vector.broadcast %138 : vector<16x1xf32> to vector<16x16xf32>
    %140 = arith.mulf %135, %139 : vector<16x16xf32>
    %141 = vector.broadcast %126 : vector<1x32xf32> to vector<16x32xf32>
    %142 = arith.mulf %68, %141 : vector<16x32xf32>
    %cst_64 = arith.constant dense<0.000000e+00> : vector<16x32xf32>
    %143 = tpu.matmul %140, %142, %cst_64 {dimension_numbers = #tpu.dot_dimension_numbers<[1], [0], [0], [1], [0, 0, 1, 1], [], []>} : vector<16x16xf32>, vector<16x32xf32>, vector<16x32xf32> -> vector<16x32xf32>
    %144 = arith.addf %125, %143 : vector<16x32xf32>
    %cst_65 = arith.constant dense<0.000000e+00> : vector<16x32xf32>
    %145 = tpu.matmul %144, %12, %cst_65 {dimension_numbers = #tpu.dot_dimension_numbers<[1], [0], [0], [1], [0, 0, 1, 1], [], []>} : vector<16x32xf32>, vector<32x32xf32>, vector<16x32xf32> -> vector<16x32xf32>
    %146 = arith.addf %4, %145 : vector<16x32xf32>
    %147 = vector.broadcast %26 : vector<1x32xf32> to vector<16x32xf32>
    %148 = arith.addf %146, %147 : vector<16x32xf32>
    %cst_66 = arith.constant dense<0.000000e+00> : vector<16xf32>
    %149 = vector.multi_reduction <add>, %148, %cst_66 [1] : vector<16x32xf32> to vector<16xf32>
    %150 = vector.shape_cast %149 : vector<16xf32> to vector<16x1xf32>
    %cst_67 = arith.constant 3.200000e+01 : f32
    %151 = vector.broadcast %cst_67 : f32 to vector<16x1xf32>
    %152 = arith.divf %150, %151 : vector<16x1xf32>
    %153 = vector.broadcast %152 : vector<16x1xf32> to vector<16x32xf32>
    %154 = arith.subf %148, %153 : vector<16x32xf32>
    %155 = arith.mulf %154, %154 : vector<16x32xf32>
    %cst_68 = arith.constant dense<0.000000e+00> : vector<16xf32>
    %156 = vector.multi_reduction <add>, %155, %cst_68 [1] : vector<16x32xf32> to vector<16xf32>
    %157 = vector.shape_cast %156 : vector<16xf32> to vector<16x1xf32>
    %cst_69 = arith.constant 3.200000e+01 : f32
    %158 = vector.broadcast %cst_69 : f32 to vector<16x1xf32>
    %159 = arith.divf %157, %158 : vector<16x1xf32>
    %160 = vector.broadcast %152 : vector<16x1xf32> to vector<16x32xf32>
    %161 = arith.subf %148, %160 : vector<16x32xf32>
    %cst_70 = arith.constant 9.99999974E-6 : f32
    %162 = vector.broadcast %cst_70 : f32 to vector<16x1xf32>
    %163 = arith.addf %159, %162 : vector<16x1xf32>
    %164 = math.rsqrt %163 : vector<16x1xf32>
    %165 = vector.broadcast %164 : vector<16x1xf32> to vector<16x32xf32>
    %166 = arith.mulf %161, %165 : vector<16x32xf32>
    %167 = vector.broadcast %28 : vector<1x32xf32> to vector<16x32xf32>
    %168 = arith.mulf %166, %167 : vector<16x32xf32>
    %169 = vector.broadcast %30 : vector<1x32xf32> to vector<16x32xf32>
    %170 = arith.addf %168, %169 : vector<16x32xf32>
    %cst_71 = arith.constant dense<0.000000e+00> : vector<16x128xf32>
    %171 = tpu.matmul %170, %34, %cst_71 {dimension_numbers = #tpu.dot_dimension_numbers<[1], [0], [0], [1], [0, 0, 1, 1], [], []>} : vector<16x32xf32>, vector<32x128xf32>, vector<16x128xf32> -> vector<16x128xf32>
    %172 = vector.broadcast %36 : vector<1x128xf32> to vector<16x128xf32>
    %173 = arith.addf %171, %172 : vector<16x128xf32>
    %cst_72 = arith.constant 1.702000e+00 : f32
    %174 = vector.broadcast %cst_72 : f32 to vector<16x128xf32>
    %175 = arith.mulf %174, %173 : vector<16x128xf32>
    %176 = arith.negf %175 : vector<16x128xf32>
    %177 = math.exp %176 : vector<16x128xf32>
    %cst_73 = arith.constant 1.000000e+00 : f32
    %178 = vector.broadcast %cst_73 : f32 to vector<16x128xf32>
    %179 = arith.addf %178, %177 : vector<16x128xf32>
    %180 = arith.divf %178, %179 : vector<16x128xf32>
    %181 = arith.mulf %173, %180 : vector<16x128xf32>
    %cst_74 = arith.constant dense<0.000000e+00> : vector<16x32xf32>
    %182 = tpu.matmul %181, %14, %cst_74 {dimension_numbers = #tpu.dot_dimension_numbers<[1], [0], [0], [1], [0, 0, 1, 1], [], []>} : vector<16x128xf32>, vector<128x32xf32>, vector<16x32xf32> -> vector<16x32xf32>
    %183 = arith.addf %148, %182 : vector<16x32xf32>
    %184 = vector.broadcast %32 : vector<1x32xf32> to vector<16x32xf32>
    %185 = arith.addf %183, %184 : vector<16x32xf32>
    %c0_75 = arith.constant 0 : index
    %c0_76 = arith.constant 0 : index
    %186 = vector.load %arg7[%c0_75, %c0_76] : memref<16x32xf32, #tpu.memory_space<vmem>>, vector<16x32xf32>
    tpu.vector_store %arg7[%c0_75, %c0_76], %185 {strides = array<i32>} : memref<16x32xf32, #tpu.memory_space<vmem>>, vector<16x32xf32>,
    %187 = arith.extui %1 : i1 to i32
    %c0_i32_77 = arith.constant 0 : i32
    %188 = arith.cmpi ne, %187, %c0_i32_77 : i32
    scf.if %188 {
      %c0_78 = arith.constant 0 : index
      %c0_79 = arith.constant 0 : index
      %189 = vector.load %arg2[%c0_78, %c0_79] : memref<8x16xf32, #tpu.memory_space<vmem>>, vector<8x16xf32>
      %cst_80 = arith.constant dense<0.000000e+00> : vector<8x32xf32>
      %190 = tpu.matmul %189, %185, %cst_80 {dimension_numbers = #tpu.dot_dimension_numbers<[1], [0], [0], [1], [0, 0, 1, 1], [], []>} : vector<8x16xf32>, vector<16x32xf32>, vector<8x32xf32> -> vector<8x32xf32>
      %c16 = arith.constant 16 : index
      %c0_81 = arith.constant 0 : index
      %191 = vector.load %arg5[%c16, %c0_81] : memref<72x128xf32, #tpu.memory_space<vmem>>, vector<1x32xf32>
      %c17 = arith.constant 17 : index
      %c0_82 = arith.constant 0 : index
      %192 = vector.load %arg5[%c17, %c0_82] : memref<72x128xf32, #tpu.memory_space<vmem>>, vector<1x32xf32>
      %cst_83 = arith.constant dense<0.000000e+00> : vector<8xf32>
      %193 = vector.multi_reduction <add>, %190, %cst_83 [1] : vector<8x32xf32> to vector<8xf32>
      %194 = vector.shape_cast %193 : vector<8xf32> to vector<8x1xf32>
      %cst_84 = arith.constant 3.200000e+01 : f32
      %195 = vector.broadcast %cst_84 : f32 to vector<8x1xf32>
      %196 = arith.divf %194, %195 : vector<8x1xf32>
      %197 = vector.broadcast %196 : vector<8x1xf32> to vector<8x32xf32>
      %198 = arith.subf %190, %197 : vector<8x32xf32>
      %199 = arith.mulf %198, %198 : vector<8x32xf32>
      %cst_85 = arith.constant dense<0.000000e+00> : vector<8xf32>
      %200 = vector.multi_reduction <add>, %199, %cst_85 [1] : vector<8x32xf32> to vector<8xf32>
      %201 = vector.shape_cast %200 : vector<8xf32> to vector<8x1xf32>
      %cst_86 = arith.constant 3.200000e+01 : f32
      %202 = vector.broadcast %cst_86 : f32 to vector<8x1xf32>
      %203 = arith.divf %201, %202 : vector<8x1xf32>
      %204 = vector.broadcast %196 : vector<8x1xf32> to vector<8x32xf32>
      %205 = arith.subf %190, %204 : vector<8x32xf32>
      %cst_87 = arith.constant 9.99999974E-6 : f32
      %206 = vector.broadcast %cst_87 : f32 to vector<8x1xf32>
      %207 = arith.addf %203, %206 : vector<8x1xf32>
      %208 = math.rsqrt %207 : vector<8x1xf32>
      %209 = vector.broadcast %208 : vector<8x1xf32> to vector<8x32xf32>
      %210 = arith.mulf %205, %209 : vector<8x32xf32>
      %211 = vector.broadcast %191 : vector<1x32xf32> to vector<8x32xf32>
      %212 = arith.mulf %210, %211 : vector<8x32xf32>
      %213 = vector.broadcast %192 : vector<1x32xf32> to vector<8x32xf32>
      %214 = arith.addf %212, %213 : vector<8x32xf32>
      %c40 = arith.constant 40 : index
      %c0_88 = arith.constant 0 : index
      %215 = vector.load %arg5[%c40, %c0_88] : memref<72x128xf32, #tpu.memory_space<vmem>>, vector<32x128xf32>
      %cst_89 = arith.constant dense<0.000000e+00> : vector<8x128xf32>
      %216 = tpu.matmul %214, %215, %cst_89 {dimension_numbers = #tpu.dot_dimension_numbers<[1], [0], [0], [1], [0, 0, 1, 1], [], []>} : vector<8x32xf32>, vector<32x128xf32>, vector<8x128xf32> -> vector<8x128xf32>
      %c0_90 = arith.constant 0 : index
      %c0_91 = arith.constant 0 : index
      %217 = vector.load %arg6[%c0_90, %c0_91] : memref<8x128xf32, #tpu.memory_space<vmem>>, vector<8x128xf32>
      tpu.vector_store %arg6[%c0_90, %c0_91], %216 {strides = array<i32>} : memref<8x128xf32, #tpu.memory_space<vmem>>, vector<8x128xf32>,
    } else {
    }
    return
  }
  func.func @transform_0(%arg0: i32) -> (i32, i32) {
    %c0_i32 = arith.constant 0 : i32
    %c0_i32_0 = arith.constant 0 : i32
    %c0_i32_1 = arith.constant 0 : i32
    return %c0_i32, %c0_i32_0 : i32, i32
  }
  func.func @transform_1(%arg0: i32) -> (i32, i32) {
    %c0_i32 = arith.constant 0 : i32
    %c0_i32_0 = arith.constant 0 : i32
    %c0_i32_1 = arith.constant 0 : i32
    return %c0_i32, %c0_i32_0 : i32, i32
  }
  func.func @transform_2(%arg0: i32) -> (i32, i32, i32) {
    %c0_i32 = arith.constant 0 : i32
    %c0_i32_0 = arith.constant 0 : i32
    %c0_i32_1 = arith.constant 0 : i32
    return %arg0, %c0_i32, %c0_i32_0 : i32, i32, i32
  }
  func.func @transform_3(%arg0: i32) -> (i32, i32, i32) {
    %c0_i32 = arith.constant 0 : i32
    %c0_i32_0 = arith.constant 0 : i32
    %c0_i32_1 = arith.constant 0 : i32
    return %arg0, %c0_i32, %c0_i32_0 : i32, i32, i32
  }
  func.func @transform_4(%arg0: i32) -> (i32, i32) {
    %c0_i32 = arith.constant 0 : i32
    %c0_i32_0 = arith.constant 0 : i32
    %c0_i32_1 = arith.constant 0 : i32
    return %c0_i32, %c0_i32_0 : i32, i32
  }
  func.func @transform_5(%arg0: i32) -> (i32, i32) {
    %c0_i32 = arith.constant 0 : i32
    %c0_i32_0 = arith.constant 0 : i32
    %c0_i32_1 = arith.constant 0 : i32
    return %c0_i32, %c0_i32_0 : i32, i32
  }
}

</mosaic_0001>

<bundles_post_ra>
// kernel: text_encoder.1
= control target key start
LH: loop header
LB: loop body
LE: loop exit
PB: predicated region body
PF: predicated region fallthrough
CT: control target
= control target key end

     0   :  { %s2311_s18 = smov 0   ;;  %s2584_s0 = inlined_call_operand.vmem [shape: f32[16,32], index: 0, kind: input, shape index: {}]   ;;  %s2585_s1 = inlined_call_operand.vmem [shape: f32[8,16], index: 1, kind: input, shape index: {}]   ;;  %s2586_s2 = inlined_call_operand.vmem [shape: f32[2,265,32], index: 2, kind: input, shape index: {}]   ;;  %s2587_s3 = inlined_call_operand.vmem [shape: f32[2,33,128], index: 3, kind: input, shape index: {}]   ;;  %s2588_s4 = inlined_call_operand.vmem [shape: f32[72,128], index: 4, kind: input, shape index: {}]   ;;  %s2589_s5 = inlined_call_operand.vmem [shape: f32[8,128], index: 5, kind: output, shape index: {}]  }
   0x1 LB: > { %s2317_s19 = sadd.s32 4294967295, %s2277_s18   ;;  %p1896_p0 = scmp.ge.s32.totalorder %s2277_s18, 1  ;;  %s2277_s18 = sphi %s2311_s18, %s15_s18  }
   0x2   : > { %p192_p1 = scmp.lt.s32.totalorder %s2277_s18, 3 }
   0x4   : > { %p193_p2 = pnand %p1896_p0, %p192_p1 }
   0x5   : > { %p220_p3 = scmp.lt.s32.totalorder (!%p193_p2), %s2317_s19, 1  ;;  %p1899_p4 = scmp.ne.s32.totalorder (!%p193_p2), %s2317_s19, 0 }
   0x6   : > { %196 = sbr.rel (%p193_p2) target bundleno = 3429 (0xd65), region = 40 }
   0xb   : > { %s221_s20 = scalar_select %p220_p3, %s2317_s19, 1 }
   0xc   : > { %234 = sbr.rel (%p1899_p4) target bundleno = 22 (0x16), region = 44 }
   0xd   : > { %s2209_s21 = smul.u32 272, %s221_s20 }
   0xe   : > { %s2210_s22 = smul.u32 40, %s221_s20 }
   0xf   : > { %s2326_s25 = scalar_lea.vmem %s2586_s2, %s2209_s21 }
  0x10   : > { %s2331_s28 = scalar_lea.vmem %s2587_s3, %s2210_s22 }
  0x11   : > { %v235_v0 = vld [vmem:[%s2584_s0] sm:$0xff]  ;;  %vm241_vm0 = vcmask 261120   ;;  %v236_v2 = vld [vmem:[%s2584_s0 + $0x8] sm:$0xff] }
  0x12   : > { %v237_v1 = vld [vmem:[%s2588_s4] sm:$0xff]  ;;  %v238_v4 = vld [vmem:[%s2588_s4 + $0x8] sm:$0xff] }
  0x13   : > { %v239_v3 = vadd.f32 %v237_v1, %v235_v0  ;;  %v240_v5 = vadd.f32 %v238_v4, %v236_v2 }
  0x15   : > { %242 = vst.msk [vmem:[#allocation2] sm:$0xff] %vm241_vm0, %v239_v3  ;;  %243 = vst.msk [vmem:[#allocation2 + $0x8] sm:$0xff] %vm241_vm0, %v240_v5 }
  0x16 PF: > { %vm294_vm1 = vcmask 261120   ;;  %v249_v20 = vld [vmem:[%s2326_s25 + $0x18] sm:$0xff]  ;;  %v248_v21 = vld [vmem:[%s2326_s25 + $0x10] sm:$0xff]  ;;  %v247_v22 = vld [vmem:[%s2326_s25 + $0x8] sm:$0xff]  ;;  %vm671_vm2 = vcmask 130048   ;;  %p1950_p5 = scmp.ne.s32.totalorder %s2317_s19, 1 }
  0x17   : > { %2045 = vmatprep.subr.mxu1 %v249_v20  ;;  %v246_v23 = vld [vmem:[%s2326_s25] sm:$0xff]  ;;  %v253_v24 = vld [vmem:[%s2326_s25 + $0x38] sm:$0xff]  ;;  %v252_v41 = vld [vmem:[%s2326_s25 + $0x30] sm:$0xff] }
  0x18   : > { %2046 = vmatpush3.msra.mxu1 %v249_v20  ;;  %v1900_v32 = vld [vmem:[%s2326_s25 + $0x100] ss:$0 sm:$0xff]  ;;  %v1901_v34 = vld [vmem:[%s2326_s25 + $0x101] ss:$0 sm:$0xff]  ;;  %v251_v42 = vld [vmem:[%s2326_s25 + $0x28] sm:$0xff] }
  0x19   : > { %2047 = vmatprep.subr.mxu1 %v248_v21  ;;  %v250_v43 = vld [vmem:[%s2326_s25 + $0x20] sm:$0xff]  ;;  %v257_v44 = vld [vmem:[%s2326_s25 + $0x58] sm:$0xff]  ;;  %v256_v45 = vld [vmem:[%s2326_s25 + $0x50] sm:$0xff] }
  0x1a   : > { %2048 = vmatpush3.msra.mxu1 %v248_v21  ;;  %v255_v46 = vld [vmem:[%s2326_s25 + $0x48] sm:$0xff]  ;;  %v254_v47 = vld [vmem:[%s2326_s25 + $0x40] sm:$0xff]  ;;  %v1932_v51 = vld [vmem:[%s2588_s4 + $0x15] ss:$0 sm:$0xff] }
  0x1b   : > { %2049 = vmatprep.subr.mxu1 %v247_v22  ;;  %v1902_v48 = vld [vmem:[%s2326_s25 + $0x102] ss:$0 sm:$0xff]  ;;  %v1911_v54 = vld [vmem:[%s2588_s4 + $0x12] ss:$0 sm:$0xff]  ;;  %v1916_v55 = vld [vmem:[%s2588_s4 + $0x13] ss:$0 sm:$0xff] }
  0x1c   : > { %v2346_v6 = vld [vmem:[#allocation2] sm:$0xff]  ;;  %v2348_v7 = vld [vmem:[#allocation2 + $0x8] sm:$0xff]  ;;  %2050 = vmatpush3.msra.mxu1 %v247_v22  ;;  %v1925_v4 = vld [vmem:[%s2588_s4 + $0x14] ss:$0 sm:$0xff] }
  0x1d   : > { %v295_v8 = vsel %vm294_vm1, %v2346_v6, 0.0  ;;  %v298_v9 = vsel %vm294_vm1, %v2348_v7, 0.0  ;;  %2051 = vmatprep.subr.mxu1 %v246_v23  ;;  %v1905_v60 = vld [vmem:[%s2326_s25 + $0x103] ss:$0 sm:$0xff]  ;;  %v1908_v1 = vld [vmem:[%s2326_s25 + $0x104] ss:$0 sm:$0xff] }
  0x1e   : > { %296 = vadd.xlane.f32.xlu0 %v295_v8  ;;  %2052 = vmatpush3.msra.mxu1 %v246_v23  ;;  %v2443_v21 = vld [vmem:[%s2588_s4 + $0x20] sm:$0xff] }
  0x1f   : > { %2056 = vmatprep.subr.mxu1 %v253_v24 }
  0x22   : > { %299 = vadd.xlane.f32.xlu0 %v298_v9 }
  0xa7   : > { %v297_v10 = vpop.xlane.xlu0 %296 }
  0xa8   : > { %v302_v11 = vmul.f32 0.03125, %v297_v10 }
  0xaa   : > { %v304_v12 = vsub.f32 %v2346_v6, %v302_v11 }
  0xab   : > { %v300_v13 = vpop.xlane.xlu0 %299 }
  0xac   : > { %v303_v14 = vmul.f32 0.03125, %v300_v13  ;;  %v306_v15 = vmul.f32 %v304_v12, %v304_v12 }
  0xae   : > { %v305_v16 = vsub.f32 %v2348_v7, %v303_v14  ;;  %v308_v17 = vsel %vm294_vm1, %v306_v15, 0.0 }
  0xaf   : > { %309 = vadd.xlane.f32.xlu1 %v308_v17 }
  0xb0   : > { %v307_v18 = vmul.f32 %v305_v16, %v305_v16 }
  0xb2   : > { %v311_v19 = vsel %vm294_vm1, %v307_v18, 0.0 }
  0xb3   : > { %312 = vadd.xlane.f32.xlu1 %v311_v19 }
 0x138   : > { %v310_v25 = vpop.xlane.xlu1 %309 }
 0x139   : > { %v314_v26 = vmul.f32 0.03125, %v310_v25 }
 0x13b   : > { %v316_v27 = vadd.f32 1e-05, %v314_v26 }
 0x13c   : > { %v313_v28 = vpop.xlane.xlu1 %312 }
 0x13d   : > { %2221 = vrsqrt.f32 %v316_v27  ;;  %v315_v29 = vmul.f32 0.03125, %v313_v28 }
 0x13f   : > { %v317_v30 = vadd.f32 1e-05, %v315_v29 }
 0x141   : > { %2223 = vrsqrt.f32 %v317_v30 }
 0x14a   : > { %v2222_v31 = vpop.eup %2221 }
 0x14b   : > { %v320_v33 = vmul.f32 %v2222_v31, %v304_v12 }
 0x14d   : > { %v326_v35 = vmul.f32 %v1900_v32, %v320_v33 }
 0x14e   : > { %v2224_v36 = vpop.eup %2223 }
 0x14f   : > { %v321_v37 = vmul.f32 %v2224_v36, %v305_v16  ;;  %v332_v38 = vadd.f32 %v1901_v34, %v326_v35 }
 0x151   : > { %v327_v39 = vmul.f32 %v1900_v32, %v321_v37  ;;  %2053 = vmatprep.mubr.msk.f32.mxu1 %vm294_vm1, %v332_v38 }
 0x153   : > { %v333_v40 = vadd.f32 %v1901_v34, %v327_v39 }
 0x155   : > { %2054 = vmatmul.mubr.msk.f32.vlgmr.msra.gmra.mxu1 %vm294_vm1, %v333_v40 }
 0x156   : > { %2057 = vmatpush3.msra.mxu1 %v253_v24  ;;  %2064 = vmatprep.mubr.msk.f32.mxu1 %vm294_vm1, %v332_v38  ;;  %v2448_v24 = vld [vmem:[%s2588_s4 + $0x18] sm:$0xff] }
 0x157   : > { %2058 = vmatprep.subr.mxu1 %v252_v41 }
 0x158   : > { %2059 = vmatpush3.msra.mxu1 %v252_v41 }
 0x159   : > { %2060 = vmatprep.subr.mxu1 %v251_v42 }
 0x15a   : > { %2061 = vmatpush3.msra.mxu1 %v251_v42 }
 0x15b   : > { %2062 = vmatprep.subr.mxu1 %v250_v43 }
 0x15c   : > { %2063 = vmatpush3.msra.mxu1 %v250_v43 }
 0x15d   : > { %2065 = vmatmul.mubr.msk.f32.vlgmr.msra.gmra.mxu1 %vm294_vm1, %v333_v40  ;;  %2067 = vmatprep.subr.mxu1 %v257_v44 }
 0x15e   : > { %2068 = vmatpush3.msra.mxu1 %v257_v44  ;;  %2075 = vmatprep.mubr.msk.f32.mxu1 %vm294_vm1, %v332_v38 }
 0x15f   : > { %2069 = vmatprep.subr.mxu1 %v256_v45 }
 0x160   : > { %2070 = vmatpush3.msra.mxu1 %v256_v45 }
 0x161   : > { %2071 = vmatprep.subr.mxu1 %v255_v46 }
 0x162   : > { %2072 = vmatpush3.msra.mxu1 %v255_v46 }
 0x163   : > { %2073 = vmatprep.subr.mxu1 %v254_v47 }
 0x164   : > { %2074 = vmatpush3.msra.mxu1 %v254_v47 }
 0x165   : > { %2076 = vmatmul.mubr.msk.f32.vlgmr.msra.gmra.mxu1 %vm294_vm1, %v333_v40 }
 0x215   : > { %v2055_v49 = vpop.f32.mrf.mxu1 }
 0x216   : > { %v416_v50 = vadd.f32 %v2055_v49, %v1902_v48 }
 0x217   : > { %v410_v52 = vpop.f32.mrf.mxu1 }
 0x218   : > { %v411_v53 = vadd.f32 %v1902_v48, %v410_v52  ;;  %v2388_v56 = vmul.f32 %v1932_v51, %v416_v50  ;;  %v583_v3 = vmul.f32 %v1911_v54, %v416_v50  ;;  %v702_v8 = vmul.f32 %v1916_v55, %v416_v50 }
 0x219   : > { %v976_v19 = vmul.f32 %v1925_v4, %v416_v50 }
 0x21a   : > { %v582_v57 = vmul.f32 %v1911_v54, %v411_v53  ;;  %v701_v58 = vmul.f32 %v1916_v55, %v411_v53  ;;  %v2390_v59 = vmul.f32 %v1932_v51, %v411_v53  ;;  %v975_v10 = vmul.f32 %v1925_v4, %v411_v53 }
 0x21c   : > { %2082 = vmatprep.mubr.msk.f32.mxu1 %vm294_vm1, %v582_v57  ;;  %2089 = vmatprep.mubr.msk.f32.mxu0 %vm294_vm1, %v701_v58 }
 0x21d   : > { %v2066_v61 = vpop.f32.mrf.mxu1 }
 0x21e   : > { %v2395_v62 = vadd.f32 %v2066_v61, %v1905_v60 }
 0x21f   : > { %v489_v63 = vpop.f32.mrf.mxu1 }
 0x220   : > { %v2397_v0 = vadd.f32 %v1905_v60, %v489_v63  ;;  %2078 = vmatprep.subr.msk.mxu1 %vm294_vm1, %v2395_v62  ;;  %2085 = vmatprep.subr.msk.mxu0 %vm294_vm1, %v2395_v62 }
 0x221   : > { %2079 = vmatpush3.xpose.msk.msra.mxu1 %vm294_vm1, %v2395_v62  ;;  %2086 = vmatpush3.xpose.msk.msra.mxu0 %vm294_vm1, %v2395_v62 }
 0x222   : > { %2080 = vmatprep.subr.msk.mxu1 %vm294_vm1, %v2397_v0  ;;  %2087 = vmatprep.subr.msk.mxu0 %vm294_vm1, %v2397_v0 }
 0x225   : > { %v2077_v2 = vpop.f32.mrf.mxu1  ;;  %2081 = vmatpush3.xpose.msk.msra.mxu1 %vm294_vm1, %v2397_v0  ;;  %2088 = vmatpush3.xpose.msk.msra.mxu0 %vm294_vm1, %v2397_v0 }
 0x226   : > { %v574_v5 = vadd.f32 %v2077_v2, %v1908_v1  ;;  %2106 = vmatprep.subr.msk.mxu0 %vm294_vm1, %v2395_v62 }
 0x227   : > { %v568_v9 = vpop.f32.mrf.mxu1 }
 0x228   : > { %v569_v11 = vadd.f32 %v1908_v1, %v568_v9  ;;  %2083 = vmatmul.mubr.msk.f32.vlgmr.msra.gmra.mxu1 %vm294_vm1, %v583_v3  ;;  %2090 = vmatmul.mubr.msk.f32.vlgmr.msra.gmra.mxu0 %vm294_vm1, %v702_v8  ;;  %v807_v12 = vmul.f32 %v1916_v55, %v574_v5  ;;  %v2426_v13 = vmul.f32 %v1925_v4, %v574_v5 }
 0x229   : > { %2107 = vmatpush3.xpose.msk.msra.mxu0 %vm294_vm1, %v2395_v62  ;;  %2110 = vmatprep.mubr.msk.f32.mxu0 %vm294_vm1, %v975_v10  ;;  %v2434_v17 = vmul.f32 %v1911_v54, %v574_v5  ;;  %v1276_v18 = vmul.f32 %v1932_v51, %v574_v5 }
 0x22a   : > { %2092 = vmatprep.subr.mxu1 %v807_v12  ;;  %2108 = vmatprep.subr.msk.mxu0 %vm294_vm1, %v2397_v0  ;;  %v806_v14 = vmul.f32 %v1916_v55, %v569_v11  ;;  %v2430_v15 = vmul.f32 %v1911_v54, %v569_v11  ;;  %v2432_v16 = vmul.f32 %v1925_v4, %v569_v11 }
 0x22b   : > { %2093 = vmatpush3.msra.mxu1 %v807_v12  ;;  %v1275_v20 = vmul.f32 %v1932_v51, %v569_v11 }
 0x22c   : > { %2094 = vmatprep.subr.mxu1 %v806_v14 }
 0x22d   : > { %2095 = vmatpush3.msra.mxu1 %v806_v14  ;;  %2109 = vmatpush3.xpose.msk.msra.mxu0 %vm294_vm1, %v2397_v0 }
 0x22e   : > { %2099 = vmatprep.subr.mxu1 %v2434_v17  ;;  %2127 = vmatprep.subr.mxu0 %v1276_v18 }
 0x230   : > { %2111 = vmatmul.mubr.msk.f32.vlgmr.msra.gmra.mxu0 %vm294_vm1, %v976_v19 }
 0x231   : > { %2128 = vmatpush3.msra.mxu0 %v1276_v18 }
 0x232   : > { %2129 = vmatprep.subr.mxu0 %v1275_v20 }
 0x233   : > { %2130 = vmatpush3.msra.mxu0 %v1275_v20 }
 0x2e8   : > { %v2084_v22 = vpop.f32.mrf.mxu1  ;;  %v2091_v23 = vpop.f32.mrf.mxu0 }
 0x2e9   : > { %v781_v25 = vadd.f32 %v2091_v23, %v2443_v21  ;;  %v668_v28 = vadd.f32 %v2084_v22, %v2443_v21 }
 0x2ea   : > { %v662_v26 = vpop.f32.mrf.mxu1  ;;  %v775_v27 = vpop.f32.mrf.mxu0 }
 0x2eb   : > { %v776_v29 = vadd.f32 %v775_v27, %v2448_v24  ;;  %v787_v30 = vsel %vm671_vm2, %v781_v25, -inf  ;;  %v663_v31 = vadd.f32 %v662_v26, %v2448_v24  ;;  %v675_v33 = vsel %vm671_vm2, %v668_v28, -inf }
 0x2ec   : > { %788 = vmax.xlane.f32.xlu1 %v787_v30 }
 0x2ed   : > { %v784_v32 = vsel %vm671_vm2, %v776_v29, -inf  ;;  %v672_v36 = vsel %vm671_vm2, %v663_v31, -inf }
 0x2ee   : > { %785 = vmax.xlane.f32.xlu0 %v784_v32 }
 0x2f0   : > { %v2112_v34 = vpop.f32.mrf.mxu0  ;;  %676 = vmax.xlane.f32.xlu1 %v675_v33 }
 0x2f1   : > { %v1055_v35 = vadd.f32 %v2112_v34, %v2443_v21 }
 0x2f2   : > { %v1049_v37 = vpop.f32.mrf.mxu0  ;;  %673 = vmax.xlane.f32.xlu0 %v672_v36 }
 0x2f3   : > { %v1050_v38 = vadd.f32 %v1049_v37, %v2448_v24  ;;  %v1061_v39 = vsel %vm671_vm2, %v1055_v35, -inf }
 0x2f4   : > { %1062 = vmax.xlane.f32.xlu1 %v1061_v39 }
 0x2f5   : > { %v1058_v40 = vsel %vm671_vm2, %v1050_v38, -inf }
 0x2f6   : > { %1059 = vmax.xlane.f32.xlu0 %v1058_v40 }
 0x375   : > { %v789_v41 = vpop.xlane.xlu1 %788 }
 0x376   : > { %v791_v42 = vsub.f32 %v781_v25, %v789_v41 }
 0x377   : > { %v786_v43 = vpop.xlane.xlu0 %785 }
 0x378   : > { %v794_v44 = vmul.f32 1.442695, %v791_v42  ;;  %v790_v45 = vsub.f32 %v776_v29, %v786_v43 }
 0x379   : > { %v677_v46 = vpop.xlane.xlu1 %676 }
 0x37a   : > { %2225 = vpow2.f32 %v794_v44  ;;  %v792_v47 = vmul.f32 1.442695, %v790_v45  ;;  %v679_v48 = vsub.f32 %v668_v28, %v677_v46 }
 0x37b   : > { %v674_v49 = vpop.xlane.xlu0 %673 }
 0x37c   : > { %2227 = vpow2.f32 %v792_v47  ;;  %v682_v50 = vmul.f32 1.442695, %v679_v48  ;;  %v678_v51 = vsub.f32 %v663_v31, %v674_v49 }
 0x37d   : > { %v1063_v52 = vpop.xlane.xlu1 %1062 }
 0x37e   : > { %2229 = vpow2.f32 %v682_v50  ;;  %v680_v53 = vmul.f32 1.442695, %v678_v51  ;;  %v1065_v54 = vsub.f32 %v1055_v35, %v1063_v52 }
 0x37f   : > { %v1060_v55 = vpop.xlane.xlu0 %1059 }
 0x380   : > { %2231 = vpow2.f32 %v680_v53  ;;  %v1068_v57 = vmul.f32 1.442695, %v1065_v54  ;;  %v1064_v58 = vsub.f32 %v1050_v38, %v1060_v55  ;;  %v261_v53 = vld [vmem:[%s2326_s25 + $0x78] sm:$0xff] }
 0x381   : > { %2134 = vmatprep.subr.mxu0 %v261_v53 }
 0x382   : > { %2233 = vpow2.f32 %v1068_v57  ;;  %v1066_v60 = vmul.f32 1.442695, %v1064_v58 }
 0x384   : > { %2235 = vpow2.f32 %v1066_v60 }
 0x387   : > { %v2226_v61 = vpop.eup %2225 }
 0x388   : > { %v799_v63 = vsel %vm671_vm2, %v2226_v61, 0.0 }
 0x389   : > { %v2228_v1 = vpop.eup %2227  ;;  %800 = vadd.xlane.f32.xlu1 %v799_v63  ;;  %v260_v63 = vld [vmem:[%s2326_s25 + $0x70] sm:$0xff] }
 0x38a   : > { %v796_v2 = vsel %vm671_vm2, %v2228_v1, 0.0 }
 0x38b   : > { %v2230_v3 = vpop.eup %2229  ;;  %797 = vadd.xlane.f32.xlu0 %v796_v2  ;;  %v258_v2 = vld [vmem:[%s2326_s25 + $0x60] sm:$0xff] }
 0x38c   : > { %v687_v4 = vsel %vm671_vm2, %v2230_v3, 0.0 }
 0x38d   : > { %v2232_v5 = vpop.eup %2231  ;;  %688 = vadd.xlane.f32.xlu1 %v687_v4 }
 0x38e   : > { %v684_v8 = vsel %vm671_vm2, %v2232_v5, 0.0 }
 0x38f   : > { %v2234_v9 = vpop.eup %2233  ;;  %685 = vadd.xlane.f32.xlu0 %v684_v8 }
 0x390   : > { %v1073_v10 = vsel %vm671_vm2, %v2234_v9, 0.0 }
 0x391   : > { %v2236_v11 = vpop.eup %2235  ;;  %1074 = vadd.xlane.f32.xlu1 %v1073_v10 }
 0x392   : > { %v1070_v12 = vsel %vm671_vm2, %v2236_v11, 0.0 }
 0x393   : > { %1071 = vadd.xlane.f32.xlu0 %v1070_v12 }
 0x412   : > { %v801_v14 = vpop.xlane.xlu1 %800 }
 0x413   : > { %2237 = vrcp.f32 %v801_v14 }
 0x414   : > { %v798_v18 = vpop.xlane.xlu0 %797 }
 0x415   : > { %2239 = vrcp.f32 %v798_v18 }
 0x416   : > { %v689_v19 = vpop.xlane.xlu1 %688 }
 0x417   : > { %2241 = vrcp.f32 %v689_v19 }
 0x418   : > { %v686_v20 = vpop.xlane.xlu0 %685 }
 0x419   : > { %2243 = vrcp.f32 %v686_v20 }
 0x41a   : > { %v1075_v22 = vpop.xlane.xlu1 %1074 }
 0x41b   : > { %2245 = vrcp.f32 %v1075_v22 }
 0x41c   : > { %v1072_v23 = vpop.xlane.xlu0 %1071 }
 0x41d   : > { %2247 = vrcp.f32 %v1072_v23 }
 0x420   : > { %v2238_v25 = vpop.eup %2237 }
 0x421   : > { %v805_v28 = vmul.f32 %v2238_v25, %v2226_v61 }
 0x422   : > { %v2240_v26 = vpop.eup %2239 }
 0x423   : > { %v804_v27 = vmul.f32 %v2240_v26, %v2228_v1  ;;  %v259_v1 = vld [vmem:[%s2326_s25 + $0x68] sm:$0xff] }
 0x424   : > { %v2242_v29 = vpop.eup %2241 }
 0x425   : > { %2096 = vmatprep.mubr.msk.f32.mxu1 %vm671_vm2, %v804_v27  ;;  %v693_v32 = vmul.f32 %v2242_v29, %v2230_v3 }
 0x426   : > { %v2244_v30 = vpop.eup %2243  ;;  %2097 = vmatmul.mubr.msk.f32.vlgmr.msra.gmra.mxu1 %vm671_vm2, %v805_v28 }
 0x427   : > { %2100 = vmatpush3.msra.mxu1 %v2434_v17  ;;  %v692_v31 = vmul.f32 %v2244_v30, %v2232_v5 }
 0x428   : > { %2101 = vmatprep.subr.mxu1 %v2430_v15  ;;  %v2246_v33 = vpop.eup %2245 }
 0x429   : > { %2102 = vmatpush3.msra.mxu1 %v2430_v15  ;;  %2103 = vmatprep.mubr.msk.f32.mxu1 %vm671_vm2, %v692_v31  ;;  %v1079_v17 = vmul.f32 %v2246_v33, %v2234_v9  ;;  %v1941_v9 = vld [vmem:[%s2326_s25 + $0x105] ss:$0 sm:$0xff]  ;;  %v289_v33 = vld [vmem:[%s2331_s28 + $0x10] sm:$0xff] }
 0x42a   : > { %v2248_v34 = vpop.eup %2247  ;;  %2113 = vmatprep.subr.mxu1 %v2426_v13  ;;  %2104 = vmatmul.mubr.msk.f32.vlgmr.msra.gmra.mxu1 %vm671_vm2, %v693_v32  ;;  %v290_v32 = vld [vmem:[%s2331_s28 + $0x18] sm:$0xff] }
 0x42b   : > { %2114 = vmatpush3.msra.mxu1 %v2426_v13  ;;  %v1078_v35 = vmul.f32 %v2248_v34, %v2236_v11  ;;  %v288_v34 = vld [vmem:[%s2331_s28 + $0x8] sm:$0xff] }
 0x42c   : > { %2115 = vmatprep.subr.mxu1 %v2432_v16 }
 0x42d   : > { %2116 = vmatpush3.msra.mxu1 %v2432_v16  ;;  %2117 = vmatprep.mubr.msk.f32.mxu1 %vm671_vm2, %v1078_v35  ;;  %v287_v35 = vld [vmem:[%s2331_s28] sm:$0xff] }
 0x42e   : > { %2120 = vmatprep.subr.msk.mxu1 %vm294_vm1, %v2395_v62  ;;  %2118 = vmatmul.mubr.msk.f32.vlgmr.msra.gmra.mxu1 %vm671_vm2, %v1079_v17 }
 0x42f   : > { %2121 = vmatpush3.xpose.msk.msra.mxu1 %vm294_vm1, %v2395_v62  ;;  %2124 = vmatprep.mubr.msk.f32.mxu1 %vm294_vm1, %v2390_v59 }
 0x430   : > { %2122 = vmatprep.subr.msk.mxu1 %vm294_vm1, %v2397_v0 }
 0x433   : > { %2123 = vmatpush3.xpose.msk.msra.mxu1 %vm294_vm1, %v2397_v0 }
 0x434   : > { %2145 = vmatprep.subr.mxu1 %v290_v32 }
 0x436   : > { %2125 = vmatmul.mubr.msk.f32.vlgmr.msra.gmra.mxu1 %vm294_vm1, %v2388_v56 }
 0x437   : > { %2146 = vmatpush3.msra.mxu1 %v290_v32 }
 0x438   : > { %2147 = vmatprep.subr.mxu1 %v289_v33 }
 0x439   : > { %2148 = vmatpush3.msra.mxu1 %v289_v33 }
 0x43a   : > { %2149 = vmatprep.subr.mxu1 %v288_v34 }
 0x43b   : > { %2150 = vmatpush3.msra.mxu1 %v288_v34 }
 0x43c   : > { %2151 = vmatprep.subr.mxu1 %v287_v35 }
 0x43d   : > { %2152 = vmatpush3.msra.mxu1 %v287_v35 }
 0x4e6   : > { %v2098_v13 = vpop.f32.mrf.mxu1 }
 0x4e8   : > { %v880_v15 = vpop.f32.mrf.mxu1 }
 0x4ea   : > { %v2105_v16 = vpop.f32.mrf.mxu1 }
 0x4eb   : > { %v967_v36 = vadd.f32 %v2105_v16, %v2098_v13 }
 0x4ec   : > { %v961_v37 = vpop.f32.mrf.mxu1 }
 0x4ed   : > { %v962_v38 = vadd.f32 %v961_v37, %v880_v15 }
 0x4ee   : > { %v2119_v39 = vpop.f32.mrf.mxu1 }
 0x4ef   : > { %v1164_v62 = vadd.f32 %v2119_v39, %v967_v36  ;;  %v1942_v39 = vld [vmem:[%s2326_s25 + $0x106] ss:$0 sm:$0xff] }
 0x4f0   : > { %v1154_v40 = vpop.f32.mrf.mxu1 }
 0x4f1   : > { %v1163_v41 = vadd.f32 %v1154_v40, %v962_v38 }
 0x4f6   : > { %v2126_v59 = vpop.f32.mrf.mxu1 }
 0x4f7   : > { %v1250_v42 = vadd.f32 %v2126_v59, %v2443_v21 }
 0x4f8   : > { %v1244_v43 = vpop.f32.mrf.mxu1 }
 0x4f9   : > { %v1245_v44 = vadd.f32 %v1244_v43, %v2448_v24  ;;  %v1256_v0 = vsel %vm671_vm2, %v1250_v42, -inf }
 0x4fa   : > { %1257 = vmax.xlane.f32.xlu1 %v1256_v0 }
 0x4fb   : > { %v1253_v56 = vsel %vm671_vm2, %v1245_v44, -inf }
 0x4fc   : > { %1254 = vmax.xlane.f32.xlu0 %v1253_v56  ;;  %v277_v56 = vld [vmem:[%s2326_s25 + $0xf8] sm:$0xff] }
 0x583   : > { %v1258_v45 = vpop.xlane.xlu1 %1257 }
 0x584   : > { %v1260_v46 = vsub.f32 %v1250_v42, %v1258_v45  ;;  %v1943_v42 = vld [vmem:[%s2326_s25 + $0x107] ss:$0 sm:$0xff]  ;;  %v276_v45 = vld [vmem:[%s2326_s25 + $0xf0] sm:$0xff] }
 0x585   : > { %v1255_v47 = vpop.xlane.xlu0 %1254 }
 0x586   : > { %v1263_v48 = vmul.f32 1.442695, %v1260_v46  ;;  %v1259_v49 = vsub.f32 %v1245_v44, %v1255_v47  ;;  %v275_v46 = vld [vmem:[%s2326_s25 + $0xe8] sm:$0xff]  ;;  %v274_v47 = vld [vmem:[%s2326_s25 + $0xe0] sm:$0xff] }
 0x588   : > { %2249 = vpow2.f32 %v1263_v48  ;;  %v1261_v50 = vmul.f32 1.442695, %v1259_v49  ;;  %v273_v48 = vld [vmem:[%s2326_s25 + $0xd8] sm:$0xff]  ;;  %v272_v49 = vld [vmem:[%s2326_s25 + $0xd0] sm:$0xff] }
 0x58a   : > { %2251 = vpow2.f32 %v1261_v50  ;;  %v271_v50 = vld [vmem:[%s2326_s25 + $0xc8] sm:$0xff] }
 0x595   : > { %v2250_v51 = vpop.eup %2249 }
 0x596   : > { %v1268_v21 = vsel %vm671_vm2, %v2250_v51, 0.0 }
 0x597   : > { %v2252_v52 = vpop.eup %2251  ;;  %1269 = vadd.xlane.f32.xlu1 %v1268_v21  ;;  %v269_v21 = vld [vmem:[%s2326_s25 + $0xb8] sm:$0xff] }
 0x598   : > { %v1265_v24 = vsel %vm671_vm2, %v2252_v52, 0.0 }
 0x599   : > { %1266 = vadd.xlane.f32.xlu0 %v1265_v24  ;;  %v267_v24 = vld [vmem:[%s2326_s25 + $0xa8] sm:$0xff] }
 0x620   : > { %v1270_v54 = vpop.xlane.xlu1 %1269 }
 0x621   : > { %2253 = vrcp.f32 %v1270_v54  ;;  %v265_v54 = vld [vmem:[%s2326_s25 + $0x98] sm:$0xff] }
 0x622   : > { %v1267_v55 = vpop.xlane.xlu0 %1266 }
 0x623   : > { %2255 = vrcp.f32 %v1267_v55  ;;  %v264_v55 = vld [vmem:[%s2326_s25 + $0x90] sm:$0xff] }
 0x62e   : > { %v2254_v57 = vpop.eup %2253 }
 0x62f   : > { %v1274_v61 = vmul.f32 %v2254_v57, %v2250_v51  ;;  %v270_v51 = vld [vmem:[%s2326_s25 + $0xc0] sm:$0xff]  ;;  %v263_v57 = vld [vmem:[%s2326_s25 + $0x88] sm:$0xff] }
 0x630   : > { %v2256_v58 = vpop.eup %2255 }
 0x631   : > { %v1273_v60 = vmul.f32 %v2256_v58, %v2252_v52  ;;  %v268_v52 = vld [vmem:[%s2326_s25 + $0xb0] sm:$0xff]  ;;  %v262_v58 = vld [vmem:[%s2326_s25 + $0x80] sm:$0xff] }
 0x633   : > { %2131 = vmatprep.mubr.msk.f32.mxu0 %vm671_vm2, %v1273_v60  ;;  %v1944_v60 = vld [vmem:[%s2331_s28 + $0x20] ss:$0 sm:$0xff] }
 0x634   : > { %2132 = vmatmul.mubr.msk.f32.vlgmr.msra.gmra.mxu0 %vm671_vm2, %v1274_v61 }
 0x635   : > { %2135 = vmatpush3.msra.mxu0 %v261_v53  ;;  %v266_v53 = vld [vmem:[%s2326_s25 + $0xa0] sm:$0xff] }
 0x636   : > { %2136 = vmatprep.subr.mxu0 %v260_v63 }
 0x637   : > { %2137 = vmatpush3.msra.mxu0 %v260_v63 }
 0x638   : > { %2138 = vmatprep.subr.mxu0 %v259_v1 }
 0x639   : > { %2139 = vmatpush3.msra.mxu0 %v259_v1 }
 0x63a   : > { %2140 = vmatprep.subr.mxu0 %v258_v2 }
 0x63b   : > { %2141 = vmatpush3.msra.mxu0 %v258_v2 }
 0x63c   : > { %2156 = vmatprep.subr.mxu0 %v277_v56 }
 0x6f4   : > { %v2133_v3 = vpop.f32.mrf.mxu0 }
 0x6f5   : > { %v1359_v8 = vadd.f32 %v2133_v3, %v1164_v62 }
 0x6f6   : > { %v1349_v4 = vpop.f32.mrf.mxu0 }
 0x6f7   : > { %v1358_v5 = vadd.f32 %v1349_v4, %v1163_v41 }
 0x6f9   : > { %2142 = vmatprep.mubr.msk.f32.mxu0 %vm294_vm1, %v1358_v5 }
 0x6fa   : > { %2143 = vmatmul.mubr.msk.f32.vlgmr.msra.gmra.mxu0 %vm294_vm1, %v1359_v8 }
 0x6fb   : > { %2157 = vmatpush3.msra.mxu0 %v277_v56 }
 0x6fc   : > { %2158 = vmatprep.subr.mxu0 %v276_v45 }
 0x6fd   : > { %2159 = vmatpush3.msra.mxu0 %v276_v45 }
 0x6fe   : > { %2160 = vmatprep.subr.mxu0 %v275_v46 }
 0x6ff   : > { %2161 = vmatpush3.msra.mxu0 %v275_v46 }
 0x700   : > { %2162 = vmatprep.subr.mxu0 %v274_v47 }
 0x701   : > { %2163 = vmatpush3.msra.mxu0 %v274_v47 }
 0x702   : > { %2164 = vmatprep.subr.mxu0 %v273_v48 }
 0x703   : > { %2165 = vmatpush3.msra.mxu0 %v273_v48 }
 0x704   : > { %2166 = vmatprep.subr.mxu0 %v272_v49 }
 0x705   : > { %2167 = vmatpush3.msra.mxu0 %v272_v49 }
 0x706   : > { %2168 = vmatprep.subr.mxu0 %v271_v50 }
 0x707   : > { %2169 = vmatpush3.msra.mxu0 %v271_v50 }
 0x708   : > { %2170 = vmatprep.subr.mxu0 %v270_v51 }
 0x709   : > { %2171 = vmatpush3.msra.mxu0 %v270_v51 }
 0x70a   : > { %2172 = vmatprep.subr.mxu0 %v269_v21 }
 0x70b   : > { %2173 = vmatpush3.msra.mxu0 %v269_v21 }
 0x70c   : > { %2174 = vmatprep.subr.mxu0 %v268_v52 }
 0x70d   : > { %2175 = vmatpush3.msra.mxu0 %v268_v52 }
 0x70e   : > { %2176 = vmatprep.subr.mxu0 %v267_v24 }
 0x70f   : > { %2177 = vmatpush3.msra.mxu0 %v267_v24 }
 0x710   : > { %2178 = vmatprep.subr.mxu0 %v266_v53 }
 0x711   : > { %2179 = vmatpush3.msra.mxu0 %v266_v53 }
 0x712   : > { %2180 = vmatprep.subr.mxu0 %v265_v54 }
 0x713   : > { %2181 = vmatpush3.msra.mxu0 %v265_v54 }
 0x714   : > { %2182 = vmatprep.subr.mxu0 %v264_v55 }
 0x715   : > { %2183 = vmatpush3.msra.mxu0 %v264_v55 }
 0x716   : > { %2184 = vmatprep.subr.mxu0 %v263_v57 }
 0x717   : > { %2185 = vmatpush3.msra.mxu0 %v263_v57 }
 0x718   : > { %2186 = vmatprep.subr.mxu0 %v262_v58 }
 0x719   : > { %2187 = vmatpush3.msra.mxu0 %v262_v58 }
 0x7ba   : > { %v2144_v10 = vpop.f32.mrf.mxu0 }
 0x7bb   : > { %v1442_v11 = vadd.f32 %v2144_v10, %v2348_v7 }
 0x7bc   : > { %v1432_v12 = vpop.f32.mrf.mxu0 }
 0x7bd   : > { %v2509_v14 = vadd.f32 %v1941_v9, %v1442_v11  ;;  %v1441_v18 = vadd.f32 %v1432_v12, %v2346_v6 }
 0x7bf   : > { %v2512_v19 = vadd.f32 %v1941_v9, %v1441_v18  ;;  %v1452_v20 = vsel %vm294_vm1, %v2509_v14, 0.0 }
 0x7c0   : > { %1453 = vadd.xlane.f32.xlu1 %v1452_v20 }
 0x7c1   : > { %v1449_v22 = vsel %vm294_vm1, %v2512_v19, 0.0 }
 0x7c2   : > { %1450 = vadd.xlane.f32.xlu0 %v1449_v22 }
 0x849   : > { %v1454_v23 = vpop.xlane.xlu1 %1453 }
 0x84a   : > { %v1456_v7 = vmul.f32 0.03125, %v1454_v23 }
 0x84b   : > { %v1451_v25 = vpop.xlane.xlu0 %1450 }
 0x84c   : > { %v1458_v26 = vsub.f32 %v2509_v14, %v1456_v7  ;;  %v1455_v6 = vmul.f32 0.03125, %v1451_v25  ;;  %v1949_v7 = vld [vmem:[%s2326_s25 + $0x108] ss:$0 sm:$0xff] }
 0x84e   : > { %v1457_v27 = vsub.f32 %v2512_v19, %v1455_v6  ;;  %v1460_v28 = vmul.f32 %v1458_v26, %v1458_v26 }
 0x850   : > { %v1464_v29 = vsel %vm294_vm1, %v1460_v28, 0.0  ;;  %v1459_v30 = vmul.f32 %v1457_v27, %v1457_v27 }
 0x851   : > { %1465 = vadd.xlane.f32.xlu1 %v1464_v29 }
 0x852   : > { %v1461_v31 = vsel %vm294_vm1, %v1459_v30, 0.0 }
 0x853   : > { %1462 = vadd.xlane.f32.xlu0 %v1461_v31 }
 0x8da   : > { %v1466_v17 = vpop.xlane.xlu1 %1465 }
 0x8db   : > { %v1468_v13 = vmul.f32 0.03125, %v1466_v17 }
 0x8dc   : > { %v1463_v15 = vpop.xlane.xlu0 %1462 }
 0x8dd   : > { %v1470_v16 = vadd.f32 1e-05, %v1468_v13  ;;  %v1467_v36 = vmul.f32 0.03125, %v1463_v15 }
 0x8df   : > { %2257 = vrsqrt.f32 %v1470_v16  ;;  %v1469_v37 = vadd.f32 1e-05, %v1467_v36 }
 0x8e1   : > { %2259 = vrsqrt.f32 %v1469_v37 }
 0x8ec   : > { %v2258_v38 = vpop.eup %2257 }
 0x8ed   : > { %v1474_v62 = vmul.f32 %v2258_v38, %v1458_v26 }
 0x8ee   : > { %v2260_v40 = vpop.eup %2259 }
 0x8ef   : > { %v1473_v41 = vmul.f32 %v2260_v40, %v1457_v27  ;;  %v1480_v59 = vmul.f32 %v1942_v39, %v1474_v62 }
 0x8f1   : > { %v1479_v43 = vmul.f32 %v1942_v39, %v1473_v41  ;;  %v1486_v0 = vadd.f32 %v1943_v42, %v1480_v59 }
 0x8f3   : > { %v1485_v44 = vadd.f32 %v1943_v42, %v1479_v43 }
 0x8f5   : > { %2153 = vmatprep.mubr.msk.f32.mxu1 %vm294_vm1, %v1485_v44 }
 0x8f6   : > { %2154 = vmatmul.mubr.msk.f32.vlgmr.msra.gmra.mxu1 %vm294_vm1, %v1486_v0 }
 0x9b6   : > { %v2155_v61 = vpop.f32.mrf.mxu1 }
 0x9b7   : > { %v1569_v63 = vadd.f32 %v2155_v61, %v1944_v60 }
 0x9b8   : > { %v1563_v1 = vpop.f32.mrf.mxu1 }
 0x9b9   : > { %v1948_v2 = vmul.f32 -1.702, %v1569_v63  ;;  %v1564_v3 = vadd.f32 %v1944_v60, %v1563_v1 }
 0x9bb   : > { %v1578_v4 = vmul.f32 1.442695, %v1948_v2  ;;  %v1947_v5 = vmul.f32 -1.702, %v1564_v3 }
 0x9bd   : > { %2261 = vpow2.f32 %v1578_v4  ;;  %v1576_v8 = vmul.f32 1.442695, %v1947_v5 }
 0x9bf   : > { %2263 = vpow2.f32 %v1576_v8 }
 0x9ca   : > { %v2262_v9 = vpop.eup %2261 }
 0x9cb   : > { %v1581_v10 = vadd.f32 1.0, %v2262_v9 }
 0x9cc   : > { %v2264_v11 = vpop.eup %2263 }
 0x9cd   : > { %v1580_v12 = vadd.f32 1.0, %v2264_v11  ;;  %2265 = vrcp.f32 %v1581_v10 }
 0x9cf   : > { %2267 = vrcp.f32 %v1580_v12 }
 0x9da   : > { %v2266_v18 = vpop.eup %2265 }
 0x9db   : > { %v1587_v23 = vmul.f32 %v2266_v18, %v1569_v63 }
 0x9dc   : > { %v2268_v20 = vpop.eup %2267 }
 0x9dd   : > { %v1586_v22 = vmul.f32 %v2268_v20, %v1564_v3 }
 0x9df   : > { %2188 = vmatprep.mubr.f32.mxu0 %v1586_v22 }
 0x9e0   : > { %2189 = vmatmul.mubr.f32.vlgmr.msra.gmra.mxu0 %v1587_v23 }
 0xaa0   : > { %v2190_v25 = vpop.f32.mrf.mxu0 }
 0xaa1   : > { %v1664_v26 = vadd.f32 %v2190_v25, %v2509_v14 }
 0xaa2   : > { %v1654_v6 = vpop.f32.mrf.mxu0 }
 0xaa3   : > { %v1670_v27 = vadd.f32 %v1949_v7, %v1664_v26  ;;  %v1663_v28 = vadd.f32 %v1654_v6, %v2512_v19  ;;  %1675 = sbr.rel (%p1950_p5) target bundleno = 3429 (0xd65), region = 48 }
 0xaa5   : > { %1672 = vst.msk [vmem:[#allocation2 + $0x8] sm:$0xff] %vm294_vm1, %v1670_v27  ;;  %v1669_v29 = vadd.f32 %v1949_v7, %v1663_v28 }
 0xaa7   : > { %1671 = vst.msk [vmem:[#allocation2] sm:$0xff] %vm294_vm1, %v1669_v29 }
 0xaa8   : > { %v2279_v30 = vmov 0.0   ;;  %vm2280_vm3 = vmmov 0   ;;  %v1676_v14 = vld [vmem:[%s2585_s1] sm:$0xff]  ;;  %v1777_v16 = vld [vmem:[%s2588_s4 + $0x38] sm:$0xff]  ;;  %v1776_v36 = vld [vmem:[%s2588_s4 + $0x30] sm:$0xff] }
 0xaa9   : > { %2191 = vmatprep.subr.mxu0 %v2279_v30  ;;  %2195 = vmatprep.mubr.msk.f32.mxu0 %vm2280_vm3, %v2279_v30  ;;  %v1778_v15 = vld [vmem:[%s2588_s4 + $0x40] sm:$0xff]  ;;  %v1775_v37 = vld [vmem:[%s2588_s4 + $0x28] sm:$0xff]  ;;  %v1952_v41 = vld [vmem:[%s2588_s4 + $0x10] ss:$0 sm:$0xff] }
 0xaaa   : > { %2192 = vmatpush3.msra.mxu0 %v1670_v27  ;;  %2198 = vmatprep.subr.mxu1 %v2279_v30  ;;  %v1953_v42 = vld [vmem:[%s2588_s4 + $0x11] ss:$0 sm:$0xff] }
 0xaab   : > { %2193 = vmatprep.subr.mxu0 %v2279_v30  ;;  %2206 = vmatprep.mubr.msk.f32.mxu1 %vm2280_vm3, %v2279_v30 }
 0xaac   : > { %2194 = vmatpush3.msra.mxu0 %v1669_v29  ;;  %2199 = vmatpush3.msra.mxu1 %v1778_v15 }
 0xaad   : > { %2196 = vmatmul.mubr.msk.f32.vlgmr.msra.gmra.mxu0 %vm671_vm2, %v1676_v14  ;;  %2200 = vmatprep.subr.mxu1 %v2279_v30 }
 0xaae   : > { %2201 = vmatpush3.msra.mxu1 %v1777_v16 }
 0xaaf   : > { %2202 = vmatprep.subr.mxu1 %v2279_v30 }
 0xab0   : > { %2203 = vmatpush3.msra.mxu1 %v1776_v36 }
 0xab1   : > { %2204 = vmatprep.subr.mxu1 %v2279_v30 }
 0xab2   : > { %2205 = vmatpush3.msra.mxu1 %v1775_v37 }
 0xb6d   : > { %v1746_v19 = vpop.f32.mrf.mxu0 }
 0xb6e   : > { %v1752_v31 = vsel %vm294_vm1, %v1746_v19, 0.0 }
 0xb6f   : > { %1753 = vadd.xlane.f32.xlu0 %v1752_v31  ;;  %v2197_v32 = vpop.f32.mrf.mxu0 }
 0xbf8   : > { %v1754_v33 = vpop.xlane.xlu0 %1753 }
 0xbf9   : > { %v1755_v34 = vmul.f32 0.03125, %v1754_v33 }
 0xbfb   : > { %v1756_v35 = vsub.f32 %v1746_v19, %v1755_v34 }
 0xbfd   : > { %v1757_v17 = vmul.f32 %v1756_v35, %v1756_v35 }
 0xbff   : > { %v1758_v13 = vsel %vm294_vm1, %v1757_v17, 0.0 }
 0xc00   : > { %1759 = vadd.xlane.f32.xlu0 %v1758_v13 }
 0xc89   : > { %v1760_v38 = vpop.xlane.xlu0 %1759 }
 0xc8a   : > { %v1761_v39 = vmul.f32 0.03125, %v1760_v38 }
 0xc8c   : > { %v1762_v62 = vadd.f32 1e-05, %v1761_v39 }
 0xc8e   : > { %2269 = vrsqrt.f32 %v1762_v62 }
 0xc9b   : > { %v2270_v40 = vpop.eup %2269 }
 0xc9c   : > { %v1764_v59 = vmul.f32 %v2270_v40, %v1756_v35 }
 0xc9e   : > { %v1769_v43 = vmul.f32 %v1952_v41, %v1764_v59 }
 0xca0   : > { %v1774_v44 = vadd.f32 %v1953_v42, %v1769_v43 }
 0xca2   : > { %2207 = vmatmul.mubr.msk.f32.vlgmr.msra.gmra.mxu1 %vm294_vm1, %v1774_v44 }
 0xd62   : > { %v1848_v0 = vpop.f32.mrf.mxu1 }
 0xd63   : > { %1852 = vst [vmem:[%s2589_s5] sm:$0xff] %v1848_v0 }
 0xd64   : > { %v2208_v56 = vpop.f32.mrf.mxu1 }
 0xd65 PF: > { %s15_s18 = sadd.s32 1, %s2277_s18  }
 0xd66   : > { %p12_p6 = scmp.ge.s32.totalorder %s15_s18, 4  }
 0xd68   :  { %14 = sbr.rel (!%p12_p6) target bundleno = 1 (0x1), region = 77 }

</bundles_post_ra>
